<compile_context>
chip_gen: v6e
topology: v6e:2x2x1
jax: 0.10.0
libtpu: 0.0.40
codegen_flags: <defaults>
</compile_context>

<pallas_src>
import jax
import jax.numpy as jnp
from jax.experimental import pallas as pl
from jax.experimental.pallas import tpu as pltpu


def _dma_copy_kernel(x_hbm_ref, o_hbm_ref):
    """Whole-array HBM -> HBM copy via a single async DMA (no VMEM round-trip)."""

    def body(sem):
        cp = pltpu.make_async_copy(x_hbm_ref, o_hbm_ref, sem)
        cp.start()
        cp.wait()

    pl.run_scoped(body, pltpu.SemaphoreType.DMA(()))


def _identity_copy(x: jax.Array) -> jax.Array:
    """Materialize a fresh copy of `x` with one grid-less HBM->HBM DMA."""
    if x.size == 0:
        # Nothing to copy; an empty array is already "identical".
        return x

    return pl.pallas_call(
        _dma_copy_kernel,
        out_shape=jax.ShapeDtypeStruct(x.shape, x.dtype),
        in_specs=[pl.BlockSpec(memory_space=pl.ANY)],
        out_specs=pl.BlockSpec(memory_space=pl.ANY),
        cost_estimate=pl.CostEstimate(
            flops=0, transcendentals=0, bytes_accessed=2 * x.nbytes
        ),
    )(x)


def identity(x: jax.Array, materialize: bool = False) -> jax.Array:
    """Forward pass of nn.Identity.

    Default: true short-circuit -- returns the input unchanged (no kernel
    launch, no HBM traffic).  Pass materialize=True to force a physically
    distinct output buffer produced by the grid-less DMA copy kernel.
    """
    if not materialize:
        return x
    return _identity_copy(x)


if __name__ == "__main__":
    key = jax.random.PRNGKey(0)
    # Small NCHW input consistent with typical conv-net usage.
    x = jax.random.normal(key, (2, 4, 16, 16), dtype=jnp.float32)

    # Default (optimal) path: zero-copy pass-through.
    y_fast = jax.block_until_ready(identity(x))
    assert y_fast.shape == x.shape and y_fast.dtype == x.dtype
    assert bool(jnp.all(y_fast == x)), "Identity pass-through mismatch"

    # Pallas DMA copy path (exercises the kernel).
    y_copy = jax.block_until_ready(identity(x, materialize=True))
    assert y_copy.shape == x.shape, (y_copy.shape, x.shape)
    assert y_copy.dtype == x.dtype, (y_copy.dtype, x.dtype)
    assert bool(jnp.all(y_copy == x)), "Identity kernel output mismatch"

    print("KERNEL_OK")
</pallas_src>

<mosaic_0001>
module attributes {stable_mosaic.version = 11 : i64} {
  func.func @_dma_copy_kernel(%arg0: memref<2x4x16x16xf32, #tpu.memory_space<any>>, %arg1: memref<2x4x16x16xf32, #tpu.memory_space<any>>) attributes {dimension_semantics = [], scalar_prefetch = 0 : i64, scratch_operands = 0 : i64, tpu.core_type = #tpu.core_type<tc>} {
    "tpu.region"() ({
      %0 = tpu.sem_alloc : memref<!tpu.dma_semaphore, #tpu.memory_space<semaphore_mem>>
      tpu.enqueue_dma source(%arg0 : memref<2x4x16x16xf32, #tpu.memory_space<any>>) target(%arg1 : memref<2x4x16x16xf32, #tpu.memory_space<any>>) target_semaphore(%0 : memref<!tpu.dma_semaphore, #tpu.memory_space<semaphore_mem>>)
      tpu.wait_dma2 semaphore(%0 : memref<!tpu.dma_semaphore, #tpu.memory_space<semaphore_mem>>) src(%arg0 : memref<2x4x16x16xf32, #tpu.memory_space<any>>) dst(%arg1 : memref<2x4x16x16xf32, #tpu.memory_space<any>>)
      tpu.yield
    }) : () -> ()
    return
  }
}

</mosaic_0001>

<bundles_post_ra>
// kernel: tpu_custom_call.1
= control target key start
LH: loop header
LB: loop body
LE: loop exit
PB: predicated region body
PF: predicated region fallthrough
CT: control target
= control target key end

     0   :  { %s23_s6 = smov [#allocation2]   ;;  %s24_s7 = smov 131072   ;;  %s42_s0 = inlined_call_operand.hbm [shape: f32[2,4,16,16], index: 0, kind: input, shape index: {}]   ;;  %s43_s1 = inlined_call_operand.hbm [shape: f32[2,4,16,16], index: 1, kind: output, shape index: {}]  }
   0x1   :  { %s25_s8 = smov 0  }
   0x2   :  { %12 = dma.general %s42_s0, 2048, %s43_s1, %s23_s6, %s24_s7, [#allocation4], %s25_s8, 0  }
   0x3   :  { %21 = dma.done.wait [#allocation2], 2048 }
   0x4   :  { %22 = vsyncadd [#allocation2], 4294965248 }

</bundles_post_ra>
